<compile_context>
chip_gen: v6e
topology: v6e:2x2x1
jax: 0.10.0
libtpu: 0.0.40
codegen_flags: <defaults>
</compile_context>

<pallas_src>
import functools

import jax
import jax.numpy as jnp
from jax.experimental import pallas as pl
from jax.experimental.pallas import tpu as pltpu

LN_EPS = 1e-5
LANE = 128


def _round_up(n, m):
    return ((n + m - 1) // m) * m


def _layernorm(h, gamma, beta):
    mean = jnp.mean(h, axis=-1, keepdims=True)
    var = jnp.mean((h - mean) ** 2, axis=-1, keepdims=True)
    return (h - mean) * jax.lax.rsqrt(var + LN_EPS) * gamma + beta


def mlp_kernel(inv_max_p, d_proj, hidden, n_pad,
               x_ref, p_ref, w1_ref, w2_ref, w3_ref, out_ref):
    # Normalize integer inputs: multiply by reciprocal instead of f32 divide.
    x_norm = x_ref[...].astype(jnp.float32) * inv_max_p

    # ---- layer 0: Linear(2, d_proj) + ReLU, done on the VPU as an outer-product
    # sum (a K=2 matmul would leave the systolic array ~98% padded with zeros).
    w_in0 = p_ref[0:1, 0:d_proj]
    w_in1 = p_ref[1:2, 0:d_proj]
    b_in = p_ref[2:3, 0:d_proj]
    h0 = x_norm[:, 0:1] * w_in0 + x_norm[:, 1:2] * w_in1 + b_in
    h0 = jnp.maximum(h0, 0.0)

    # ---- layer 1: Linear -> ReLU -> LayerNorm (MXU matmul, f32 accumulate)
    b1 = p_ref[3:4, 0:hidden]
    g1 = p_ref[4:5, 0:hidden]
    be1 = p_ref[5:6, 0:hidden]
    h1 = jnp.dot(h0, w1_ref[...], preferred_element_type=jnp.float32)
    h1 = jnp.maximum(h1 + b1, 0.0)
    h1 = _layernorm(h1, g1, be1)

    # ---- layer 2: Linear -> ReLU -> LayerNorm
    b2 = p_ref[6:7, 0:hidden]
    g2 = p_ref[7:8, 0:hidden]
    be2 = p_ref[8:9, 0:hidden]
    h2 = jnp.dot(h1, w2_ref[...], preferred_element_type=jnp.float32)
    h2 = jnp.maximum(h2 + b2, 0.0)
    h2 = _layernorm(h2, g2, be2)

    # ---- final Linear into the lane-dense (padded to 128) logit tile
    b3 = p_ref[9:10, 0:n_pad]
    out = jnp.dot(h2, w3_ref[...], preferred_element_type=jnp.float32) + b3
    out_ref[...] = out.astype(out_ref.dtype)


def mlp_forward(x, params, max_p_out, *, tb=None):
    """x: (B, 2) int32 operand pairs. Returns (B, max_p_out) float32 logits."""
    B = x.shape[0]
    (w_in, b_in, w1, b1, g1, be1, w2, b2, g2, be2, w3, b3) = params
    d_proj = w_in.shape[1]
    hidden = w1.shape[1]
    n_out = w3.shape[1]
    assert n_out == max_p_out
    n_pad = _round_up(max_p_out, LANE)

    # Lane-dense output: zero-pad the final layer to a multiple of 128 columns.
    w3p = jnp.zeros((hidden, n_pad), jnp.float32).at[:, :n_out].set(w3)
    b3p = jnp.zeros((n_pad,), jnp.float32).at[:n_out].set(b3.reshape(-1))

    # Pack all small row-vector params (+ the (2, d_proj) input-proj weight) into a
    # single (16, L) aligned slab: one DMA, no per-row padded VMEM tiles.
    L = _round_up(max(d_proj, hidden, n_pad), LANE)
    packed = jnp.zeros((16, L), jnp.float32)
    packed = packed.at[0:2, :d_proj].set(w_in)
    packed = packed.at[2, :d_proj].set(b_in.reshape(-1))
    packed = packed.at[3, :hidden].set(b1.reshape(-1))
    packed = packed.at[4, :hidden].set(g1.reshape(-1))
    packed = packed.at[5, :hidden].set(be1.reshape(-1))
    packed = packed.at[6, :hidden].set(b2.reshape(-1))
    packed = packed.at[7, :hidden].set(g2.reshape(-1))
    packed = packed.at[8, :hidden].set(be2.reshape(-1))
    packed = packed.at[9, :n_pad].set(b3p)

    # Batch tile: one big tile for small B (amortizes the ~0.35us/step pipeline
    # overhead and fills MXU M); for large B use 512-row tiles so v7x megacore
    # still gets >= 2 "parallel" grid steps to shard across its 2 TensorCores.
    if tb is None:
        if B <= 512:
            tb = B
        else:
            tb = next((t for t in (512, 256, 128, 64, 32, 16, 8) if B % t == 0), B)
    assert B % tb == 0 and (tb == B or tb % 8 == 0)

    full = lambda a: pl.BlockSpec(a.shape, lambda i: (0, 0))

    out_padded = pl.pallas_call(
        functools.partial(mlp_kernel, 1.0 / float(max_p_out), d_proj, hidden, n_pad),
        out_shape=jax.ShapeDtypeStruct((B, n_pad), jnp.float32),
        grid_spec=pltpu.PrefetchScalarGridSpec(
            num_scalar_prefetch=0,
            grid=(B // tb,),
            in_specs=[
                pl.BlockSpec((tb, x.shape[1]), lambda i: (i, 0)),  # x batch tile
                full(packed),                                      # packed small params
                full(w1), full(w2), full(w3p),                     # resident weights
            ],
            out_specs=pl.BlockSpec((tb, n_pad), lambda i: (i, 0)),
        ),
        compiler_params=pltpu.CompilerParams(
            dimension_semantics=("parallel",)),
    )(x, packed, w1, w2, w3p)

    # Padded logit columns are exactly zero (zero-padded w3/b3); slice them off so
    # nothing leaks into downstream softmax/argmax.
    return out_padded[:, :max_p_out]


def init_params(key, max_p_out, input_proj_dim, hidden_dim):
    """Deterministic init mirroring nn.Linear default (U(-1/sqrt(fan_in), +));
    LayerNorm gamma=1, beta=0. Weights stored (in, out)."""
    def linear(key, fan_in, fan_out):
        kw, kb = jax.random.split(key)
        bound = 1.0 / jnp.sqrt(float(fan_in))
        w = jax.random.uniform(kw, (fan_in, fan_out), jnp.float32, -bound, bound)
        b = jax.random.uniform(kb, (1, fan_out), jnp.float32, -bound, bound)
        return w, b

    d_proj = input_proj_dim * 2
    k0, k1, k2, k3 = jax.random.split(key, 4)
    w_in, b_in = linear(k0, 2, d_proj)
    w1, b1 = linear(k1, d_proj, hidden_dim)
    w2, b2 = linear(k2, hidden_dim, hidden_dim)
    w3, b3 = linear(k3, hidden_dim, max_p_out)
    g1 = jnp.ones((1, hidden_dim), jnp.float32)
    be1 = jnp.zeros((1, hidden_dim), jnp.float32)
    g2 = jnp.ones((1, hidden_dim), jnp.float32)
    be2 = jnp.zeros((1, hidden_dim), jnp.float32)
    return (w_in, b_in, w1, b1, g1, be1, w2, b2, g2, be2, w3, b3)


def reference_forward(x, params, max_p_out):
    (w_in, b_in, w1, b1, g1, be1, w2, b2, g2, be2, w3, b3) = params
    xn = x.astype(jnp.float32) / float(max_p_out)
    h0 = jnp.maximum(xn @ w_in + b_in, 0.0)
    h1 = jnp.maximum(h0 @ w1 + b1, 0.0)
    m = h1.mean(-1, keepdims=True); v = ((h1 - m) ** 2).mean(-1, keepdims=True)
    h1 = (h1 - m) / jnp.sqrt(v + LN_EPS) * g1 + be1
    h2 = jnp.maximum(h1 @ w2 + b2, 0.0)
    m = h2.mean(-1, keepdims=True); v = ((h2 - m) ** 2).mean(-1, keepdims=True)
    h2 = (h2 - m) / jnp.sqrt(v + LN_EPS) * g2 + be2
    return h2 @ w3 + b3


if __name__ == "__main__":
    max_p_out = 16
    input_proj_dim = 16   # -> input_proj: Linear(2, 32)
    hidden_dim = 32
    batch = 16

    key = jax.random.PRNGKey(0)
    k_params, k_x = jax.random.split(key)
    params = init_params(k_params, max_p_out, input_proj_dim, hidden_dim)
    # integer operand pairs for modular arithmetic, values in [0, max_p_out)
    x = jax.random.randint(k_x, (batch, 2), 0, max_p_out, dtype=jnp.int32)

    out = mlp_forward(x, params, max_p_out)
    out = jax.block_until_ready(out)

    ref = reference_forward(x, params, max_p_out)
    assert out.shape == (batch, max_p_out)
    assert jnp.allclose(out, ref, atol=1e-4, rtol=1e-4), "mismatch vs reference"

    print("KERNEL_OK")
</pallas_src>

<mosaic_0001>
module attributes {stable_mosaic.version = 11 : i64} {
  func.func @mlp_kernel(%arg0: i32, %arg1: memref<16x2xi32, #tpu.memory_space<vmem>>, %arg2: memref<16x128xf32, #tpu.memory_space<vmem>>, %arg3: memref<32x32xf32, #tpu.memory_space<vmem>>, %arg4: memref<32x32xf32, #tpu.memory_space<vmem>>, %arg5: memref<32x128xf32, #tpu.memory_space<vmem>>, %arg6: memref<16x128xf32, #tpu.memory_space<vmem>>) attributes {dimension_semantics = [#tpu.dimension_semantics<parallel>], iteration_bounds = array<i64: 1>, scalar_prefetch = 0 : i64, scratch_operands = 0 : i64, tpu.core_type = #tpu.core_type<tc>, window_params = [{transform_indices = @transform_0, window_bounds = array<i64: 16, 2>}, {pipeline_mode = #tpu.pipeline_mode<synchronous>, transform_indices = @transform_1, window_bounds = array<i64: 16, 128>}, {pipeline_mode = #tpu.pipeline_mode<synchronous>, transform_indices = @transform_2, window_bounds = array<i64: 32, 32>}, {pipeline_mode = #tpu.pipeline_mode<synchronous>, transform_indices = @transform_3, window_bounds = array<i64: 32, 32>}, {pipeline_mode = #tpu.pipeline_mode<synchronous>, transform_indices = @transform_4, window_bounds = array<i64: 32, 128>}, {transform_indices = @transform_5, window_bounds = array<i64: 16, 128>}]} {
    %c0 = arith.constant 0 : index
    %c0_0 = arith.constant 0 : index
    %0 = vector.load %arg1[%c0, %c0_0] : memref<16x2xi32, #tpu.memory_space<vmem>>, vector<16x2xi32>
    %1 = arith.sitofp %0 : vector<16x2xi32> to vector<16x2xf32>
    %cst = arith.constant 6.250000e-02 : f32
    %2 = vector.broadcast %cst : f32 to vector<16x2xf32>
    %3 = arith.mulf %1, %2 : vector<16x2xf32>
    %c0_1 = arith.constant 0 : index
    %c0_2 = arith.constant 0 : index
    %4 = vector.load %arg2[%c0_1, %c0_2] : memref<16x128xf32, #tpu.memory_space<vmem>>, vector<1x32xf32>
    %c1 = arith.constant 1 : index
    %c0_3 = arith.constant 0 : index
    %5 = vector.load %arg2[%c1, %c0_3] : memref<16x128xf32, #tpu.memory_space<vmem>>, vector<1x32xf32>
    %c2 = arith.constant 2 : index
    %c0_4 = arith.constant 0 : index
    %6 = vector.load %arg2[%c2, %c0_4] : memref<16x128xf32, #tpu.memory_space<vmem>>, vector<1x32xf32>
    %7 = vector.extract_strided_slice %3 {offsets = [0, 0], sizes = [16, 1], strides = [1, 1]} : vector<16x2xf32> to vector<16x1xf32>
    %8 = vector.broadcast %7 : vector<16x1xf32> to vector<16x32xf32>
    %9 = vector.broadcast %4 : vector<1x32xf32> to vector<16x32xf32>
    %10 = arith.mulf %8, %9 : vector<16x32xf32>
    %11 = vector.extract_strided_slice %3 {offsets = [0, 1], sizes = [16, 1], strides = [1, 1]} : vector<16x2xf32> to vector<16x1xf32>
    %12 = vector.broadcast %11 : vector<16x1xf32> to vector<16x32xf32>
    %13 = vector.broadcast %5 : vector<1x32xf32> to vector<16x32xf32>
    %14 = arith.mulf %12, %13 : vector<16x32xf32>
    %15 = arith.addf %10, %14 : vector<16x32xf32>
    %16 = vector.broadcast %6 : vector<1x32xf32> to vector<16x32xf32>
    %17 = arith.addf %15, %16 : vector<16x32xf32>
    %cst_5 = arith.constant 0.000000e+00 : f32
    %18 = vector.broadcast %cst_5 : f32 to vector<16x32xf32>
    %19 = arith.maximumf %17, %18 : vector<16x32xf32>
    %c3 = arith.constant 3 : index
    %c0_6 = arith.constant 0 : index
    %20 = vector.load %arg2[%c3, %c0_6] : memref<16x128xf32, #tpu.memory_space<vmem>>, vector<1x32xf32>
    %c4 = arith.constant 4 : index
    %c0_7 = arith.constant 0 : index
    %21 = vector.load %arg2[%c4, %c0_7] : memref<16x128xf32, #tpu.memory_space<vmem>>, vector<1x32xf32>
    %c5 = arith.constant 5 : index
    %c0_8 = arith.constant 0 : index
    %22 = vector.load %arg2[%c5, %c0_8] : memref<16x128xf32, #tpu.memory_space<vmem>>, vector<1x32xf32>
    %c0_9 = arith.constant 0 : index
    %c0_10 = arith.constant 0 : index
    %23 = vector.load %arg3[%c0_9, %c0_10] : memref<32x32xf32, #tpu.memory_space<vmem>>, vector<32x32xf32>
    %cst_11 = arith.constant dense<0.000000e+00> : vector<16x32xf32>
    %24 = tpu.matmul %19, %23, %cst_11 {dimension_numbers = #tpu.dot_dimension_numbers<[1], [0], [0], [1], [0, 0, 1, 1], [], []>} : vector<16x32xf32>, vector<32x32xf32>, vector<16x32xf32> -> vector<16x32xf32>
    %25 = vector.broadcast %20 : vector<1x32xf32> to vector<16x32xf32>
    %26 = arith.addf %24, %25 : vector<16x32xf32>
    %cst_12 = arith.constant 0.000000e+00 : f32
    %27 = vector.broadcast %cst_12 : f32 to vector<16x32xf32>
    %28 = arith.maximumf %26, %27 : vector<16x32xf32>
    %cst_13 = arith.constant dense<0.000000e+00> : vector<16xf32>
    %29 = vector.multi_reduction <add>, %28, %cst_13 [1] : vector<16x32xf32> to vector<16xf32>
    %30 = vector.shape_cast %29 : vector<16xf32> to vector<16x1xf32>
    %cst_14 = arith.constant 3.200000e+01 : f32
    %31 = vector.broadcast %cst_14 : f32 to vector<16x1xf32>
    %32 = arith.divf %30, %31 : vector<16x1xf32>
    %33 = vector.broadcast %32 : vector<16x1xf32> to vector<16x32xf32>
    %34 = arith.subf %28, %33 : vector<16x32xf32>
    %35 = arith.mulf %34, %34 : vector<16x32xf32>
    %cst_15 = arith.constant dense<0.000000e+00> : vector<16xf32>
    %36 = vector.multi_reduction <add>, %35, %cst_15 [1] : vector<16x32xf32> to vector<16xf32>
    %37 = vector.shape_cast %36 : vector<16xf32> to vector<16x1xf32>
    %cst_16 = arith.constant 3.200000e+01 : f32
    %38 = vector.broadcast %cst_16 : f32 to vector<16x1xf32>
    %39 = arith.divf %37, %38 : vector<16x1xf32>
    %40 = vector.broadcast %32 : vector<16x1xf32> to vector<16x32xf32>
    %41 = arith.subf %28, %40 : vector<16x32xf32>
    %cst_17 = arith.constant 9.99999974E-6 : f32
    %42 = vector.broadcast %cst_17 : f32 to vector<16x1xf32>
    %43 = arith.addf %39, %42 : vector<16x1xf32>
    %44 = math.rsqrt %43 : vector<16x1xf32>
    %45 = vector.broadcast %44 : vector<16x1xf32> to vector<16x32xf32>
    %46 = arith.mulf %41, %45 : vector<16x32xf32>
    %47 = vector.broadcast %21 : vector<1x32xf32> to vector<16x32xf32>
    %48 = arith.mulf %46, %47 : vector<16x32xf32>
    %49 = vector.broadcast %22 : vector<1x32xf32> to vector<16x32xf32>
    %50 = arith.addf %48, %49 : vector<16x32xf32>
    %c6 = arith.constant 6 : index
    %c0_18 = arith.constant 0 : index
    %51 = vector.load %arg2[%c6, %c0_18] : memref<16x128xf32, #tpu.memory_space<vmem>>, vector<1x32xf32>
    %c7 = arith.constant 7 : index
    %c0_19 = arith.constant 0 : index
    %52 = vector.load %arg2[%c7, %c0_19] : memref<16x128xf32, #tpu.memory_space<vmem>>, vector<1x32xf32>
    %c8 = arith.constant 8 : index
    %c0_20 = arith.constant 0 : index
    %53 = vector.load %arg2[%c8, %c0_20] : memref<16x128xf32, #tpu.memory_space<vmem>>, vector<1x32xf32>
    %c0_21 = arith.constant 0 : index
    %c0_22 = arith.constant 0 : index
    %54 = vector.load %arg4[%c0_21, %c0_22] : memref<32x32xf32, #tpu.memory_space<vmem>>, vector<32x32xf32>
    %cst_23 = arith.constant dense<0.000000e+00> : vector<16x32xf32>
    %55 = tpu.matmul %50, %54, %cst_23 {dimension_numbers = #tpu.dot_dimension_numbers<[1], [0], [0], [1], [0, 0, 1, 1], [], []>} : vector<16x32xf32>, vector<32x32xf32>, vector<16x32xf32> -> vector<16x32xf32>
    %56 = vector.broadcast %51 : vector<1x32xf32> to vector<16x32xf32>
    %57 = arith.addf %55, %56 : vector<16x32xf32>
    %cst_24 = arith.constant 0.000000e+00 : f32
    %58 = vector.broadcast %cst_24 : f32 to vector<16x32xf32>
    %59 = arith.maximumf %57, %58 : vector<16x32xf32>
    %cst_25 = arith.constant dense<0.000000e+00> : vector<16xf32>
    %60 = vector.multi_reduction <add>, %59, %cst_25 [1] : vector<16x32xf32> to vector<16xf32>
    %61 = vector.shape_cast %60 : vector<16xf32> to vector<16x1xf32>
    %cst_26 = arith.constant 3.200000e+01 : f32
    %62 = vector.broadcast %cst_26 : f32 to vector<16x1xf32>
    %63 = arith.divf %61, %62 : vector<16x1xf32>
    %64 = vector.broadcast %63 : vector<16x1xf32> to vector<16x32xf32>
    %65 = arith.subf %59, %64 : vector<16x32xf32>
    %66 = arith.mulf %65, %65 : vector<16x32xf32>
    %cst_27 = arith.constant dense<0.000000e+00> : vector<16xf32>
    %67 = vector.multi_reduction <add>, %66, %cst_27 [1] : vector<16x32xf32> to vector<16xf32>
    %68 = vector.shape_cast %67 : vector<16xf32> to vector<16x1xf32>
    %cst_28 = arith.constant 3.200000e+01 : f32
    %69 = vector.broadcast %cst_28 : f32 to vector<16x1xf32>
    %70 = arith.divf %68, %69 : vector<16x1xf32>
    %71 = vector.broadcast %63 : vector<16x1xf32> to vector<16x32xf32>
    %72 = arith.subf %59, %71 : vector<16x32xf32>
    %cst_29 = arith.constant 9.99999974E-6 : f32
    %73 = vector.broadcast %cst_29 : f32 to vector<16x1xf32>
    %74 = arith.addf %70, %73 : vector<16x1xf32>
    %75 = math.rsqrt %74 : vector<16x1xf32>
    %76 = vector.broadcast %75 : vector<16x1xf32> to vector<16x32xf32>
    %77 = arith.mulf %72, %76 : vector<16x32xf32>
    %78 = vector.broadcast %52 : vector<1x32xf32> to vector<16x32xf32>
    %79 = arith.mulf %77, %78 : vector<16x32xf32>
    %80 = vector.broadcast %53 : vector<1x32xf32> to vector<16x32xf32>
    %81 = arith.addf %79, %80 : vector<16x32xf32>
    %c9 = arith.constant 9 : index
    %c0_30 = arith.constant 0 : index
    %82 = vector.load %arg2[%c9, %c0_30] : memref<16x128xf32, #tpu.memory_space<vmem>>, vector<1x128xf32>
    %c0_31 = arith.constant 0 : index
    %c0_32 = arith.constant 0 : index
    %83 = vector.load %arg5[%c0_31, %c0_32] : memref<32x128xf32, #tpu.memory_space<vmem>>, vector<32x128xf32>
    %cst_33 = arith.constant dense<0.000000e+00> : vector<16x128xf32>
    %84 = tpu.matmul %81, %83, %cst_33 {dimension_numbers = #tpu.dot_dimension_numbers<[1], [0], [0], [1], [0, 0, 1, 1], [], []>} : vector<16x32xf32>, vector<32x128xf32>, vector<16x128xf32> -> vector<16x128xf32>
    %85 = vector.broadcast %82 : vector<1x128xf32> to vector<16x128xf32>
    %86 = arith.addf %84, %85 : vector<16x128xf32>
    %c0_34 = arith.constant 0 : index
    %c0_35 = arith.constant 0 : index
    %87 = vector.load %arg6[%c0_34, %c0_35] : memref<16x128xf32, #tpu.memory_space<vmem>>, vector<16x128xf32>
    tpu.vector_store %arg6[%c0_34, %c0_35], %86 {strides = array<i32>} : memref<16x128xf32, #tpu.memory_space<vmem>>, vector<16x128xf32>,
    return
  }
  func.func @transform_0(%arg0: i32) -> (i32, i32) {
    %c0_i32 = arith.constant 0 : i32
    %c0_i32_0 = arith.constant 0 : i32
    return %arg0, %c0_i32 : i32, i32
  }
  func.func @transform_1(%arg0: i32) -> (i32, i32) {
    %c0_i32 = arith.constant 0 : i32
    %c0_i32_0 = arith.constant 0 : i32
    %c0_i32_1 = arith.constant 0 : i32
    return %c0_i32, %c0_i32_0 : i32, i32
  }
  func.func @transform_2(%arg0: i32) -> (i32, i32) {
    %c0_i32 = arith.constant 0 : i32
    %c0_i32_0 = arith.constant 0 : i32
    %c0_i32_1 = arith.constant 0 : i32
    return %c0_i32, %c0_i32_0 : i32, i32
  }
  func.func @transform_3(%arg0: i32) -> (i32, i32) {
    %c0_i32 = arith.constant 0 : i32
    %c0_i32_0 = arith.constant 0 : i32
    %c0_i32_1 = arith.constant 0 : i32
    return %c0_i32, %c0_i32_0 : i32, i32
  }
  func.func @transform_4(%arg0: i32) -> (i32, i32) {
    %c0_i32 = arith.constant 0 : i32
    %c0_i32_0 = arith.constant 0 : i32
    %c0_i32_1 = arith.constant 0 : i32
    return %c0_i32, %c0_i32_0 : i32, i32
  }
  func.func @transform_5(%arg0: i32) -> (i32, i32) {
    %c0_i32 = arith.constant 0 : i32
    %c0_i32_0 = arith.constant 0 : i32
    return %arg0, %c0_i32 : i32, i32
  }
}

</mosaic_0001>

<bundles_post_ra>
// kernel: tpu_custom_call.1
= control target key start
LH: loop header
LB: loop body
LE: loop exit
PB: predicated region body
PF: predicated region fallthrough
CT: control target
= control target key end

     0   :  { %10 = vsyncpa [#allocation3], 0  ;;  %s772_s0 = inlined_call_operand.vmem [shape: s32[16,2], index: 0, kind: input, shape index: {}]   ;;  %s773_s1 = inlined_call_operand.vmem [shape: f32[16,128], index: 1, kind: input, shape index: {}]   ;;  %s774_s2 = inlined_call_operand.hbm [shape: f32[32,32], index: 2, kind: input, shape index: {}]   ;;  %s775_s3 = inlined_call_operand.hbm [shape: f32[32,32], index: 3, kind: input, shape index: {}]   ;;  %s776_s4 = inlined_call_operand.hbm [shape: f32[32,128], index: 4, kind: input, shape index: {}]   ;;  %s777_s5 = inlined_call_operand.hbm [shape: f32[16,128], index: 5, kind: output, shape index: {}]  }
   0x1   :  { %11 = vsyncpa [#allocation6], 0 }
   0x2   :  { %12 = vsyncpa [#allocation4], 0  ;;  %s660_s18 = smov [#allocation5]   ;;  %s661_s20 = smov [#allocation2]  }
   0x3   :  { %s34_s19 = sshll.u32 %s660_s18, 4  ;;  %s22_s21 = sshll.u32 %s661_s20, 4  ;;  %s35_s19 = int_to_ptr.vmem [resolvable:$true] %s34_s19  ;;  %s23_s21 = int_to_ptr.vmem [resolvable:$true] %s22_s21 }
   0x4   :  { %s582_s22 = scalar_lea.vmem %s35_s19, 512  ;;  %p587_p1 = scmp.lt.s32.totalorder %s35_s19, %s35_s19 }
   0x5   :  { %p583_p0 = scmp.ne.s32.totalorder %s35_s19, %s582_s22  ;;  %p588_p2 = scmp.lt.s32.totalorder %s582_s22, %s582_s22 }
   0x7   :  { %p589_p3 = por %p588_p2, %p587_p1 }
   0x9   :  { %p590_p4 = pnand %p589_p3, %p583_p0 }
   0xb   :  { %593 = shalt.err (!%p590_p4)
}
   0xc   :  { %s662_s23 = smov 128   ;;  %s663_s24 = smov 8  }
   0xd   :  { %40 = dma.hbm_to_vmem [thread:$0]  %s775_s3, 512, %s35_s19, [#allocation6], %s662_s23, %s662_s23, %s663_s24  }
   0xe   :  { %s602_s27 = scalar_lea.vmem %s23_s21, 512  ;;  %p607_p6 = scmp.lt.s32.totalorder %s23_s21, %s23_s21 }
   0xf   :  { %p603_p5 = scmp.ne.s32.totalorder %s23_s21, %s602_s27  ;;  %p608_p7 = scmp.lt.s32.totalorder %s602_s27, %s602_s27 }
  0x11   :  { %p609_p8 = por %p608_p7, %p607_p6 }
  0x13   :  { %p610_p9 = pnand %p609_p8, %p603_p5 }
  0x15   :  { %613 = shalt.err (!%p610_p9)
}
  0x16   :  { %28 = dma.hbm_to_vmem [thread:$0]  %s774_s2, 512, %s23_s21, [#allocation3], %s662_s23, %s662_s23, %s663_s24  }
  0x17   :  { %s664_s30 = smov [#allocation7]  }
  0x18   :  { %s46_s6 = sshll.u32 %s664_s30, 4  ;;  %s47_s6 = int_to_ptr.vmem [resolvable:$true] %s46_s6 }
  0x19   :  { %s622_s7 = scalar_lea.vmem %s47_s6, 512  ;;  %p627_p11 = scmp.lt.s32.totalorder %s47_s6, %s47_s6 }
  0x1a   :  { %p623_p10 = scmp.ne.s32.totalorder %s47_s6, %s622_s7  ;;  %p628_p12 = scmp.lt.s32.totalorder %s622_s7, %s622_s7 }
  0x1c   :  { %p629_p13 = por %p628_p12, %p627_p11 }
  0x1e   :  { %p630_p0 = pnand %p629_p13, %p623_p10 }
  0x20   :  { %633 = shalt.err (!%p630_p0)
}
  0x21   :  { %52 = dma.hbm_to_vmem [thread:$0]  %s776_s4, 512, %s47_s6, [#allocation6], %s662_s23, %s662_s23, %s663_s24  }
  0x22   :  { %654 = dma.done.wait [#allocation3], 512  }
  0x23   :  { %655 = vsyncadd [#allocation3], 4294966784 }
  0x24   :  { %656 = dma.done.wait [#allocation6], 1024  }
  0x25   :  { %657 = vsyncadd [#allocation6], 4294966272  ;;  %v665_v0 = vmov 0   ;;  %v63_v1 = vld [vmem:[%s772_s0 + $0x8] sm:$0xff]  ;;  %v62_v2 = vld [vmem:[%s772_s0] sm:$0xff]  ;;  %v666_v9 = vmov 1  }
  0x26   :  { %564 = vset.pattern.permute.xlu1 %v665_v0  ;;  %562 = vset.pattern.permute.xlu0 %v665_v0  ;;  %v65_v3 = vcvt.s32.f32 %v63_v1  ;;  %v64_v4 = vcvt.s32.f32 %v62_v2  ;;  %v117_v7 = vld [vmem:[#allocation2 + $0x18] sm:$0xff]  ;;  %v116_v8 = vld [vmem:[#allocation2 + $0x10] sm:$0xff]  ;;  %v115_v10 = vld [vmem:[#allocation2 + $0x8] sm:$0xff]  ;;  %vm122_vm0 = vcmask 261120   ;;  %s667_s7 = smov [#allocation8]  }
  0x27   :  { %521 = vmatprep.subr.mxu0 %v117_v7  ;;  %v114_v11 = vld [vmem:[#allocation2] sm:$0xff]  ;;  %v251_v48 = vld [vmem:[#allocation5 + $0x18] sm:$0xff]  ;;  %v250_v49 = vld [vmem:[#allocation5 + $0x10] sm:$0xff]  ;;  %s474_s3 = sshll.u32 %s667_s7, 4  ;;  %s475_s3 = int_to_ptr.vmem [resolvable:$true] %s474_s3 }
  0x28   :  { %v67_v5 = vmul.f32 0.0625, %v65_v3  ;;  %v66_v6 = vmul.f32 0.0625, %v64_v4  ;;  %522 = vmatpush3.msra.mxu0 %v117_v7  ;;  %v487_v14 = vld [vmem:[%s773_s1] ss:$0 sm:$0xff]  ;;  %v488_v15 = vld [vmem:[%s773_s1 + $0x1] ss:$0 sm:$0xff]  ;;  %532 = vmatprep.subr.mxu1 %v251_v48  ;;  %p639_p2 = scmp.lt.s32.totalorder %s475_s3, %s475_s3 }
  0x29   :  { %523 = vmatprep.subr.mxu0 %v116_v8  ;;  %v489_v22 = vld [vmem:[%s773_s1 + $0x2] ss:$0 sm:$0xff]  ;;  %v490_v29 = vld [vmem:[%s773_s1 + $0x3] ss:$0 sm:$0xff]  ;;  %533 = vmatpush3.msra.mxu1 %v251_v48  ;;  %v249_v50 = vld [vmem:[#allocation5 + $0x8] sm:$0xff]  ;;  %s634_s8 = scalar_lea.vmem %s475_s3, 256 }
  0x2a   :  { %78 = vperm.xlu1 %564, %v67_v5   ;;  %73 = vperm.xlu0 %562, %v66_v6   ;;  %v248_v51 = vld [vmem:[#allocation5] sm:$0xff]  ;;  %p635_p1 = scmp.ne.s32.totalorder %s475_s3, %s634_s8  ;;  %p640_p3 = scmp.lt.s32.totalorder %s634_s8, %s634_s8 }
  0x2b   :  { %524 = vmatpush3.msra.mxu0 %v116_v8  ;;  %534 = vmatprep.subr.mxu1 %v250_v49  ;;  %v493_v59 = vld [vmem:[%s773_s1 + $0x4] ss:$0 sm:$0xff]  ;;  %v494_v0 = vld [vmem:[%s773_s1 + $0x5] ss:$0 sm:$0xff]  ;;  %v495_v4 = vld [vmem:[%s773_s1 + $0x6] ss:$0 sm:$0xff] }
  0x2c   :  { %525 = vmatprep.subr.mxu0 %v115_v10  ;;  %535 = vmatpush3.msra.mxu1 %v250_v49  ;;  %p641_p4 = por %p640_p3, %p639_p2 }
  0x2d   :  { %526 = vmatpush3.msra.mxu0 %v115_v10  ;;  %536 = vmatprep.subr.mxu1 %v249_v50 }
  0x2e   :  { %565 = vset.pattern.permute.xlu1 %v666_v9  ;;  %563 = vset.pattern.permute.xlu0 %v666_v9  ;;  %p642_p5 = pnand %p641_p4, %p635_p1 }
  0x2f   :  { %92 = vperm.xlu1 %565, %v67_v5   ;;  %88 = vperm.xlu0 %563, %v66_v6  }
  0x30   :  { %527 = vmatprep.subr.mxu0 %v114_v11  ;;  %537 = vmatpush3.msra.mxu1 %v249_v50 }
  0x31   :  { %528 = vmatpush3.msra.mxu0 %v114_v11  ;;  %538 = vmatprep.subr.mxu1 %v248_v51 }
  0x32   :  { %539 = vmatpush3.msra.mxu1 %v248_v51 }
  0xa5   :  { %v74_v12 = vpop.permute.xlu0 %73  ;;  %v79_v13 = vpop.permute.xlu1 %78 }
  0xa6   :  { %v85_v18 = vmul.f32 %v487_v14, %v74_v12  ;;  %v86_v19 = vmul.f32 %v487_v14, %v79_v13 }
  0xaa   :  { %v93_v16 = vpop.permute.xlu1 %92  ;;  %v89_v17 = vpop.permute.xlu0 %88 }
  0xab   :  { %v100_v20 = vmul.f32 %v488_v15, %v93_v16  ;;  %v99_v21 = vmul.f32 %v488_v15, %v89_v17 }
  0xad   :  { %v102_v23 = vadd.f32 %v100_v20, %v86_v19  ;;  %v101_v24 = vadd.f32 %v99_v21, %v85_v18 }
  0xaf   :  { %v107_v25 = vadd.f32 %v489_v22, %v101_v24  ;;  %v108_v26 = vadd.f32 %v489_v22, %v102_v23  ;;  %v381_v23 = vld [vmem:[#allocation7 + $0x18] sm:$0xff]  ;;  %v380_v24 = vld [vmem:[#allocation7 + $0x10] sm:$0xff] }
  0xb0   :  { %543 = vmatprep.subr.mxu0 %v381_v23 }
  0xb1   :  { %v109_v27 = vmax.f32 %v107_v25, 0.0  ;;  %v110_v28 = vmax.f32 %v108_v26, 0.0  ;;  %v379_v25 = vld [vmem:[#allocation7 + $0x8] sm:$0xff]  ;;  %v378_v26 = vld [vmem:[#allocation7] sm:$0xff] }
  0xb3   :  { %529 = vmatprep.mubr.msk.f32.mxu0 %vm122_vm0, %v109_v27 }
  0xb4   :  { %530 = vmatmul.mubr.msk.f32.vlgmr.msra.gmra.mxu0 %vm122_vm0, %v110_v28 }
  0xb5   :  { %544 = vmatpush3.msra.mxu0 %v381_v23 }
  0xb6   :  { %545 = vmatprep.subr.mxu0 %v380_v24 }
  0xb7   :  { %546 = vmatpush3.msra.mxu0 %v380_v24 }
  0xb8   :  { %547 = vmatprep.subr.mxu0 %v379_v25 }
  0xb9   :  { %548 = vmatpush3.msra.mxu0 %v379_v25 }
  0xba   :  { %549 = vmatprep.subr.mxu0 %v378_v26 }
  0xbb   :  { %550 = vmatpush3.msra.mxu0 %v378_v26 }
 0x174   :  { %v531_v30 = vpop.f32.mrf.mxu0 }
 0x175   :  { %v201_v31 = vadd.f32 %v531_v30, %v490_v29 }
 0x176   :  { %v195_v32 = vpop.f32.mrf.mxu0 }
 0x177   :  { %v205_v33 = vmax.f32 %v201_v31, 0.0  ;;  %v196_v34 = vadd.f32 %v490_v29, %v195_v32 }
 0x179   :  { %v204_v35 = vmax.f32 %v196_v34, 0.0  ;;  %v209_v36 = vsel %vm122_vm0, %v205_v33, 0.0  ;;  %v498_v34 = vld [vmem:[%s773_s1 + $0x7] ss:$0 sm:$0xff] }
 0x17a   :  { %210 = vadd.xlane.f32.xlu0 %v209_v36 }
 0x17b   :  { %v206_v37 = vsel %vm122_vm0, %v204_v35, 0.0 }
 0x17c   :  { %207 = vadd.xlane.f32.xlu1 %v206_v37 }
 0x203   :  { %v211_v38 = vpop.xlane.xlu0 %210 }
 0x204   :  { %v214_v39 = vmul.f32 0.03125, %v211_v38 }
 0x205   :  { %v208_v40 = vpop.xlane.xlu1 %207 }
 0x206   :  { %v216_v41 = vsub.f32 %v205_v33, %v214_v39  ;;  %v213_v42 = vmul.f32 0.03125, %v208_v40  ;;  %v499_v39 = vld [vmem:[%s773_s1 + $0x8] ss:$0 sm:$0xff] }
 0x208   :  { %v215_v43 = vsub.f32 %v204_v35, %v213_v42  ;;  %v218_v44 = vmul.f32 %v216_v41, %v216_v41 }
 0x20a   :  { %v222_v45 = vsel %vm122_vm0, %v218_v44, 0.0  ;;  %v217_v46 = vmul.f32 %v215_v43, %v215_v43 }
 0x20b   :  { %223 = vadd.xlane.f32.xlu1 %v222_v45 }
 0x20c   :  { %v219_v47 = vsel %vm122_vm0, %v217_v46, 0.0 }
 0x20d   :  { %220 = vadd.xlane.f32.xlu0 %v219_v47 }
 0x294   :  { %v224_v52 = vpop.xlane.xlu1 %223 }
 0x295   :  { %v226_v53 = vmul.f32 0.03125, %v224_v52 }
 0x296   :  { %v221_v54 = vpop.xlane.xlu0 %220 }
 0x297   :  { %v228_v55 = vadd.f32 1e-05, %v226_v53  ;;  %v225_v56 = vmul.f32 0.03125, %v221_v54 }
 0x299   :  { %566 = vrsqrt.f32 %v228_v55  ;;  %v227_v57 = vadd.f32 1e-05, %v225_v56 }
 0x29b   :  { %568 = vrsqrt.f32 %v227_v57 }
 0x2a6   :  { %v567_v58 = vpop.eup %566 }
 0x2a7   :  { %v232_v60 = vmul.f32 %v567_v58, %v216_v41 }
 0x2a8   :  { %v569_v61 = vpop.eup %568 }
 0x2a9   :  { %v231_v62 = vmul.f32 %v569_v61, %v215_v43  ;;  %v238_v63 = vmul.f32 %v493_v59, %v232_v60  ;;  %v500_v43 = vld [vmem:[%s773_s1 + $0x9] ss:$0 sm:$0xff] }
 0x2ab   :  { %v237_v1 = vmul.f32 %v493_v59, %v231_v62  ;;  %v244_v3 = vadd.f32 %v494_v0, %v238_v63 }
 0x2ad   :  { %v243_v2 = vadd.f32 %v494_v0, %v237_v1 }
 0x2af   :  { %540 = vmatprep.mubr.msk.f32.mxu1 %vm122_vm0, %v243_v2 }
 0x2b0   :  { %541 = vmatmul.mubr.msk.f32.vlgmr.msra.gmra.mxu1 %vm122_vm0, %v244_v3 }
 0x370   :  { %v542_v5 = vpop.f32.mrf.mxu1 }
 0x371   :  { %v334_v6 = vadd.f32 %v542_v5, %v495_v4 }
 0x372   :  { %v328_v7 = vpop.f32.mrf.mxu1 }
 0x373   :  { %v338_v8 = vmax.f32 %v334_v6, 0.0  ;;  %v329_v9 = vadd.f32 %v495_v4, %v328_v7 }
 0x375   :  { %v337_v10 = vmax.f32 %v329_v9, 0.0  ;;  %v342_v11 = vsel %vm122_vm0, %v338_v8, 0.0 }
 0x376   :  { %343 = vadd.xlane.f32.xlu1 %v342_v11 }
 0x377   :  { %v339_v12 = vsel %vm122_vm0, %v337_v10, 0.0 }
 0x378   :  { %340 = vadd.xlane.f32.xlu0 %v339_v12 }
 0x3ff   :  { %v344_v13 = vpop.xlane.xlu1 %343 }
 0x400   :  { %v346_v14 = vmul.f32 0.03125, %v344_v13 }
 0x401   :  { %v341_v15 = vpop.xlane.xlu0 %340 }
 0x402   :  { %v348_v16 = vsub.f32 %v338_v8, %v346_v14  ;;  %v345_v17 = vmul.f32 0.03125, %v341_v15 }
 0x404   :  { %v347_v18 = vsub.f32 %v337_v10, %v345_v17  ;;  %v350_v19 = vmul.f32 %v348_v16, %v348_v16 }
 0x406   :  { %v354_v20 = vsel %vm122_vm0, %v350_v19, 0.0  ;;  %v349_v21 = vmul.f32 %v347_v18, %v347_v18 }
 0x407   :  { %355 = vadd.xlane.f32.xlu1 %v354_v20 }
 0x408   :  { %v351_v22 = vsel %vm122_vm0, %v349_v21, 0.0 }
 0x409   :  { %352 = vadd.xlane.f32.xlu0 %v351_v22 }
 0x490   :  { %v356_v27 = vpop.xlane.xlu1 %355 }
 0x491   :  { %v358_v28 = vmul.f32 0.03125, %v356_v27 }
 0x492   :  { %v353_v29 = vpop.xlane.xlu0 %352 }
 0x493   :  { %v360_v30 = vadd.f32 1e-05, %v358_v28  ;;  %v357_v31 = vmul.f32 0.03125, %v353_v29 }
 0x495   :  { %570 = vrsqrt.f32 %v360_v30  ;;  %v359_v32 = vadd.f32 1e-05, %v357_v31 }
 0x497   :  { %572 = vrsqrt.f32 %v359_v32 }
 0x4a2   :  { %v571_v33 = vpop.eup %570 }
 0x4a3   :  { %v364_v35 = vmul.f32 %v571_v33, %v348_v16 }
 0x4a4   :  { %v573_v36 = vpop.eup %572 }
 0x4a5   :  { %v363_v37 = vmul.f32 %v573_v36, %v347_v18  ;;  %v370_v38 = vmul.f32 %v498_v34, %v364_v35 }
 0x4a7   :  { %v369_v40 = vmul.f32 %v498_v34, %v363_v37  ;;  %v376_v42 = vadd.f32 %v499_v39, %v370_v38 }
 0x4a9   :  { %v375_v41 = vadd.f32 %v499_v39, %v369_v40 }
 0x4ab   :  { %551 = vmatprep.mubr.msk.f32.mxu0 %vm122_vm0, %v375_v41 }
 0x4ac   :  { %552 = vmatmul.mubr.msk.f32.vlgmr.msra.gmra.mxu0 %vm122_vm0, %v376_v42 }
 0x56c   :  { %v553_v44 = vpop.f32.mrf.mxu0 }
 0x56d   :  { %v464_v45 = vadd.f32 %v553_v44, %v500_v43 }
 0x56e   :  { %v458_v46 = vpop.f32.mrf.mxu0 }
 0x56f   :  { %468 = vst [vmem:[#allocation8 + $0x8] sm:$0xff] %v464_v45  ;;  %v459_v47 = vadd.f32 %v500_v43, %v458_v46 }
 0x571   :  { %467 = vst [vmem:[#allocation8] sm:$0xff] %v459_v47 }
 0x572   :  { %645 = shalt.err (!%p642_p5)
}
 0x573   :  { %480 = dma.vmem_to_hbm [thread:$0]  %s475_s3, 256, %s777_s5, [#allocation4], %s662_s23, %s662_s23, %s663_s24  }
 0x574   :  { %658 = dma.done.wait [#allocation4], 256  }
 0x575   :  { %659 = vsyncadd [#allocation4], 4294967040 }
 0x576   :  { %484 = vsyncpa [#allocation3], 1 }
 0x577   :  { %485 = vsyncpa [#allocation6], 1 }
 0x578   :  { %486 = vsyncpa [#allocation4], 1 }

</bundles_post_ra>
